<compile_context>
chip_gen: v7x
topology: tpu7x:2x2x1
jax: 0.10.0
libtpu: 0.0.40
codegen_flags: <defaults>
</compile_context>

<pallas_src>
import functools

import numpy as np
import jax
import jax.numpy as jnp
from jax.experimental import pallas as pl
from jax.experimental.pallas import tpu as pltpu


# ------------------------------- helpers -------------------------------------
def _round_up(v: int, m: int) -> int:
    return ((v + m - 1) // m) * m


def _pick_tile(dim: int, candidates) -> int:
    """Largest candidate that evenly divides `dim`; otherwise the full dim."""
    for c in candidates:
        if c <= dim and dim % c == 0:
            return c
    return dim


def _vmem_capacity_bytes() -> int:
    """Per-core VMEM capacity (generation-aware); conservative default if the
    query is unavailable (64 MiB = v7x per-TensorCore)."""
    try:
        return int(pltpu.get_tpu_info().vmem_capacity_bytes)
    except Exception:
        return 64 * 1024 * 1024


def _fused_vmem_bytes(x, params, tm: int, compute_dtype=None) -> int:
    """VMEM footprint estimate of the fused-MLP kernel.

    Pallas double-buffers every input by default, including the constant-index
    weight/bias blocks, so weights are counted 2x.
    # TODO(synk): use pipeline_mode=pl.Buffered(1) on the resident weight blocks
    # instead of double-counting once single-buffering is verified on all gens.
    """
    op = np.dtype(compute_dtype or x.dtype).itemsize
    f32 = 4
    total = sum(2 * w.size * op + 2 * b.size * f32 for w, b in params)
    k_in = x.shape[1]
    n_out = params[-1][0].shape[1]
    max_feat = max([k_in] + [w.shape[1] for w, _ in params])
    total += 2 * tm * k_in * op          # double-buffered input tile
    total += 2 * tm * n_out * f32        # double-buffered output tile
    total += 4 * tm * max_feat * f32     # in-flight intermediates / spill headroom
    return total


# ------------------------ fused whole-MLP kernel ------------------------------
def _mlp_fused_kernel(*refs, num_linear: int):
    """refs = (x_ref, w0, b0, w1, b1, ..., o_ref). Chains all layers in VMEM."""
    x_ref, o_ref = refs[0], refs[-1]
    wb_refs = refs[1:-1]

    h = x_ref[...]
    for layer in range(num_linear):
        w = wb_refs[2 * layer][...]
        b = wb_refs[2 * layer + 1][...]          # (1, N) f32, broadcasts over rows
        # Operands already pre-cast in the wrapper; astype is a no-op for f32
        # path and only touches the (small) intermediate activation for bf16.
        h = jnp.dot(h.astype(w.dtype), w, preferred_element_type=jnp.float32) + b
        if layer < num_linear - 1:
            h = jnp.maximum(h, 0.0)              # ReLU in f32 (safe on v5e too)
    o_ref[...] = h.astype(o_ref.dtype)


def mlp_fused_pallas(x, params, *, tm_max: int = 256, compute_dtype=None,
                     vmem_limit_bytes=None):
    """Run the entire MLP in a single pallas_call. Weights stay VMEM-resident."""
    M, K = x.shape
    num_linear = len(params)
    n_out = params[-1][0].shape[1]
    out_dtype = x.dtype

    # Pre-cast operands OUTSIDE the kernel: halves weight DMA + VMEM residency.
    if compute_dtype is not None:
        x = x.astype(compute_dtype)
        params = [(w.astype(compute_dtype), b) for w, b in params]

    sub = 16 if compute_dtype is not None else 8   # bf16 sublane packing
    tm = min(tm_max, _round_up(M, sub))
    m_pad = _round_up(M, tm)
    xp = jnp.pad(x, ((0, m_pad - M), (0, 0))) if m_pad != M else x

    in_specs = [pl.BlockSpec((tm, K), lambda i: (i, 0))]
    args = [xp]
    for w, b in params:
        k_in, n_l = w.shape
        # Full-array blocks with a constant index_map: DMA'd once, VMEM-resident.
        in_specs.append(pl.BlockSpec((k_in, n_l), lambda i: (0, 0)))
        in_specs.append(pl.BlockSpec((1, n_l), lambda i: (0, 0)))
        args.append(w)
        args.append(b.reshape(1, n_l).astype(jnp.float32))   # bias kept f32

    kernel = functools.partial(_mlp_fused_kernel, num_linear=num_linear)

    out = pl.pallas_call(
        kernel,
        out_shape=jax.ShapeDtypeStruct((m_pad, n_out), out_dtype),
        grid_spec=pltpu.PrefetchScalarGridSpec(
            num_scalar_prefetch=0,
            grid=(m_pad // tm,),                  # rows only; >1 step shards
            in_specs=in_specs,                    # across megacore TCs on v7x
            out_specs=pl.BlockSpec((tm, n_out), lambda i: (i, 0)),
        ),
        compiler_params=pltpu.CompilerParams(
            dimension_semantics=("parallel",),
            vmem_limit_bytes=vmem_limit_bytes,
        ),
    )(*args)

    return out[:M] if m_pad != M else out


# -------------------- general per-layer tiled fallback ------------------------
def _linear_kernel(x_ref, w_ref, b_ref, o_ref, acc_ref, *, apply_relu: bool):
    """Tiled matmul + bias (+ ReLU). f32 accumulation in VMEM scratch; the
    output tile is written once, in its own dtype, on the last k step."""
    k = pl.program_id(2)
    partial = jnp.dot(x_ref[...], w_ref[...], preferred_element_type=jnp.float32)

    @pl.when(k == 0)
    def _():
        acc_ref[...] = partial + b_ref[...]      # fold bias into the first step

    @pl.when(k != 0)
    def _():
        acc_ref[...] += partial

    @pl.when(k == pl.num_programs(2) - 1)
    def _():
        out = acc_ref[...]
        if apply_relu:
            out = jnp.maximum(out, 0.0)
        o_ref[...] = out.astype(o_ref.dtype)


def linear_pallas(x, w, b, *, apply_relu: bool, out_dtype=None,
                  vmem_limit_bytes=None):
    """y = relu?(x @ w + b) with x:(M,K), w:(K,N), b:(N,). Pads ragged M."""
    M, K = x.shape
    K2, N = w.shape
    assert K == K2 and b.shape == (N,)
    out_dtype = out_dtype or x.dtype

    # Row tile: large (amortize ~0.35us/step) but keep >=2 row steps when the
    # batch allows it so megacore can shard on v7x.
    if M >= 1024:
        tm = 512
    elif M >= 512:
        tm = 256
    else:
        tm = _round_up(M, 16)
    # Lane/reduction tiles: MXU-aligned (multiples of 128), up to 512 / full K.
    tn = _pick_tile(N, (512, 256, 128))
    tk = _pick_tile(K, (2048, 1024, 512, 256, 128))

    m_pad = _round_up(M, tm)
    xp = jnp.pad(x, ((0, m_pad - M), (0, 0))) if m_pad != M else x

    if vmem_limit_bytes is None:
        vmem_limit_bytes = int(_vmem_capacity_bytes() * 0.7)

    kernel = functools.partial(_linear_kernel, apply_relu=apply_relu)
    out = pl.pallas_call(
        kernel,
        out_shape=jax.ShapeDtypeStruct((m_pad, N), out_dtype),
        grid_spec=pltpu.PrefetchScalarGridSpec(
            num_scalar_prefetch=0,
            grid=(m_pad // tm, N // tn, K // tk),
            in_specs=[
                pl.BlockSpec((tm, tk), lambda i, j, k: (i, k)),   # x tile
                pl.BlockSpec((tk, tn), lambda i, j, k: (k, j)),   # w tile
                pl.BlockSpec((1, tn), lambda i, j, k: (0, j)),    # bias tile (f32)
            ],
            out_specs=pl.BlockSpec((tm, tn), lambda i, j, k: (i, j)),
            scratch_shapes=[pltpu.VMEM((tm, tn), jnp.float32)],
        ),
        compiler_params=pltpu.CompilerParams(
            dimension_semantics=("parallel", "parallel", "arbitrary"),
            vmem_limit_bytes=vmem_limit_bytes,
        ),
    )(xp, w, b.reshape(1, N).astype(jnp.float32))

    return out[:M] if m_pad != M else out


# ----------------------------- MLP wrapper -----------------------------------
def init_mlp_params(key, in_features, out_features, hidden_features, num_layers,
                    dtype=jnp.float32):
    """Mirrors MLP.__init__: [in->hid, (hid->hid)*(num_layers-1), hid->out].
    kaiming_normal_ on weights (std = sqrt(2/fan_in)), zero bias."""
    dims = [in_features] + [hidden_features] * num_layers + [out_features]
    params = []
    for fan_in, fan_out in zip(dims[:-1], dims[1:]):
        key, wk = jax.random.split(key)
        # PyTorch weight is (out, in); store transposed (in, out) for x @ W.
        w = (jax.random.normal(wk, (fan_in, fan_out), dtype=jnp.float32)
             * jnp.sqrt(2.0 / fan_in)).astype(dtype)
        bias = jnp.zeros((fan_out,), dtype=dtype)
        params.append((w, bias))
    return params


def mlp_forward(x, params, *, compute_dtype=None):
    """Fused single-kernel MLP when it fits in VMEM, else per-layer tiled kernels."""
    out_dtype = x.dtype
    vmem_cap = _vmem_capacity_bytes()
    budget = int(vmem_cap * 0.7)          # headroom for Mosaic internal scratch
    vmem_limit = budget

    M = x.shape[0]
    sub = 16 if compute_dtype is not None else 8
    tm = min(256, _round_up(M, sub))
    if _fused_vmem_bytes(x, params, tm, compute_dtype) <= budget:
        return mlp_fused_pallas(x, params, tm_max=256, compute_dtype=compute_dtype,
                                vmem_limit_bytes=vmem_limit)

    # Large-model fallback: per-layer tiled matmuls. compute_dtype is threaded
    # through (bf16 operands on the MXU, f32 accumulation), intermediates stay
    # in the compact activation dtype end-to-end.
    # TODO(synk): optional fp8 weight path with per-channel scales on v7x.
    if compute_dtype is not None:
        x = x.astype(compute_dtype)
        params = [(w.astype(compute_dtype), b) for w, b in params]
    act_dtype = compute_dtype or out_dtype

    h = x
    for w, b in params[:-1]:
        h = linear_pallas(h, w, b, apply_relu=True, out_dtype=act_dtype,
                          vmem_limit_bytes=vmem_limit)
    w, b = params[-1]
    return linear_pallas(h, w, b, apply_relu=False, out_dtype=out_dtype,
                         vmem_limit_bytes=vmem_limit)


def mlp_reference(x, params):
    for w, b in params[:-1]:
        x = jnp.maximum(x @ w + b, 0.0)
    w, b = params[-1]
    return x @ w + b


# --------------------------------- main ---------------------------------------
if __name__ == "__main__":
    # Small shapes consistent with the module's forward (2D input (batch, features)).
    batch = 16
    in_features = 128
    hidden_features = 256
    out_features = 128
    num_layers = 2  # -> 3 Linear layers total, as in the PyTorch module

    key = jax.random.PRNGKey(0)
    key, xk = jax.random.split(key)
    x = jax.random.normal(xk, (batch, in_features), dtype=jnp.float32)
    params = init_mlp_params(key, in_features, out_features, hidden_features,
                             num_layers)

    # --- primary path: fused whole-MLP kernel (f32, exact module semantics) ---
    out = jax.block_until_ready(mlp_forward(x, params))
    ref = mlp_reference(x, params)
    assert out.shape == (batch, out_features)
    assert out.dtype == x.dtype
    assert jnp.allclose(out, ref, atol=1e-4, rtol=1e-4), "fused MLP mismatch"

    # --- fused kernel with bf16 operands pre-cast in the wrapper (looser tol) --
    out_bf16 = jax.block_until_ready(
        mlp_forward(x, params, compute_dtype=jnp.bfloat16))
    assert jnp.allclose(out_bf16.astype(jnp.float32), ref,
                        atol=5e-2, rtol=5e-2), "bf16 MLP mismatch"

    # --- exercise the general tiled fallback kernel (f32 operands) ------------
    key, xk2, wk2 = jax.random.split(key, 3)
    M2, K2, N2 = 512, 2048, 512
    x2 = jax.random.normal(xk2, (M2, K2), dtype=jnp.float32)
    w2 = jax.random.normal(wk2, (K2, N2), dtype=jnp.float32) * jnp.sqrt(2.0 / K2)
    b2 = jnp.full((N2,), 0.1, dtype=jnp.float32)
    out2 = jax.block_until_ready(linear_pallas(x2, w2, b2, apply_relu=True))
    ref2 = jnp.maximum(x2 @ w2 + b2, 0.0)
    assert out2.dtype == jnp.float32
    assert jnp.allclose(out2, ref2, atol=1e-2, rtol=1e-2), "tiled linear mismatch"

    # --- tiled fallback with bf16 operands / f32 accumulation -----------------
    x2b = x2.astype(jnp.bfloat16)
    w2b = w2.astype(jnp.bfloat16)
    out3 = jax.block_until_ready(
        linear_pallas(x2b, w2b, b2, apply_relu=False, out_dtype=jnp.float32))
    ref3 = x2b.astype(jnp.float32) @ w2b.astype(jnp.float32) + b2
    assert jnp.allclose(out3, ref3, atol=2e-2, rtol=2e-2), "bf16 tiled mismatch"

    print("KERNEL_OK")
</pallas_src>

<mosaic_0001>
module attributes {stable_mosaic.version = 11 : i64} {
  func.func @_mlp_fused_kernel(%arg0: i32, %arg1: memref<16x128xf32, #tpu.memory_space<vmem>>, %arg2: memref<128x256xf32, #tpu.memory_space<vmem>>, %arg3: memref<1x256xf32, #tpu.memory_space<vmem>>, %arg4: memref<256x256xf32, #tpu.memory_space<vmem>>, %arg5: memref<1x256xf32, #tpu.memory_space<vmem>>, %arg6: memref<256x128xf32, #tpu.memory_space<vmem>>, %arg7: memref<1x128xf32, #tpu.memory_space<vmem>>, %arg8: memref<16x128xf32, #tpu.memory_space<vmem>>) attributes {dimension_semantics = [#tpu.dimension_semantics<parallel>], iteration_bounds = array<i64: 1>, scalar_prefetch = 0 : i64, scratch_operands = 0 : i64, tpu.core_type = #tpu.core_type<tc>, window_params = [{transform_indices = @transform_0, window_bounds = array<i64: 16, 128>}, {pipeline_mode = #tpu.pipeline_mode<synchronous>, transform_indices = @transform_1, window_bounds = array<i64: 128, 256>}, {pipeline_mode = #tpu.pipeline_mode<synchronous>, transform_indices = @transform_2, window_bounds = array<i64: 1, 256>}, {pipeline_mode = #tpu.pipeline_mode<synchronous>, transform_indices = @transform_3, window_bounds = array<i64: 256, 256>}, {pipeline_mode = #tpu.pipeline_mode<synchronous>, transform_indices = @transform_4, window_bounds = array<i64: 1, 256>}, {pipeline_mode = #tpu.pipeline_mode<synchronous>, transform_indices = @transform_5, window_bounds = array<i64: 256, 128>}, {pipeline_mode = #tpu.pipeline_mode<synchronous>, transform_indices = @transform_6, window_bounds = array<i64: 1, 128>}, {transform_indices = @transform_7, window_bounds = array<i64: 16, 128>}]} {
    %c0 = arith.constant 0 : index
    %c0_0 = arith.constant 0 : index
    %0 = vector.load %arg1[%c0, %c0_0] : memref<16x128xf32, #tpu.memory_space<vmem>>, vector<16x128xf32>
    %c0_1 = arith.constant 0 : index
    %c0_2 = arith.constant 0 : index
    %1 = vector.load %arg2[%c0_1, %c0_2] : memref<128x256xf32, #tpu.memory_space<vmem>>, vector<128x256xf32>
    %c0_3 = arith.constant 0 : index
    %c0_4 = arith.constant 0 : index
    %2 = vector.load %arg3[%c0_3, %c0_4] : memref<1x256xf32, #tpu.memory_space<vmem>>, vector<1x256xf32>
    %cst = arith.constant dense<0.000000e+00> : vector<16x256xf32>
    %3 = tpu.matmul %0, %1, %cst {dimension_numbers = #tpu.dot_dimension_numbers<[1], [0], [0], [1], [0, 0, 1, 1], [], []>} : vector<16x128xf32>, vector<128x256xf32>, vector<16x256xf32> -> vector<16x256xf32>
    %4 = vector.broadcast %2 : vector<1x256xf32> to vector<16x256xf32>
    %5 = arith.addf %3, %4 : vector<16x256xf32>
    %cst_5 = arith.constant 0.000000e+00 : f32
    %6 = vector.broadcast %cst_5 : f32 to vector<16x256xf32>
    %7 = arith.maximumf %5, %6 : vector<16x256xf32>
    %c0_6 = arith.constant 0 : index
    %c0_7 = arith.constant 0 : index
    %8 = vector.load %arg4[%c0_6, %c0_7] : memref<256x256xf32, #tpu.memory_space<vmem>>, vector<256x256xf32>
    %c0_8 = arith.constant 0 : index
    %c0_9 = arith.constant 0 : index
    %9 = vector.load %arg5[%c0_8, %c0_9] : memref<1x256xf32, #tpu.memory_space<vmem>>, vector<1x256xf32>
    %cst_10 = arith.constant dense<0.000000e+00> : vector<16x256xf32>
    %10 = tpu.matmul %7, %8, %cst_10 {dimension_numbers = #tpu.dot_dimension_numbers<[1], [0], [0], [1], [0, 0, 1, 1], [], []>} : vector<16x256xf32>, vector<256x256xf32>, vector<16x256xf32> -> vector<16x256xf32>
    %11 = vector.broadcast %9 : vector<1x256xf32> to vector<16x256xf32>
    %12 = arith.addf %10, %11 : vector<16x256xf32>
    %cst_11 = arith.constant 0.000000e+00 : f32
    %13 = vector.broadcast %cst_11 : f32 to vector<16x256xf32>
    %14 = arith.maximumf %12, %13 : vector<16x256xf32>
    %c0_12 = arith.constant 0 : index
    %c0_13 = arith.constant 0 : index
    %15 = vector.load %arg6[%c0_12, %c0_13] : memref<256x128xf32, #tpu.memory_space<vmem>>, vector<256x128xf32>
    %c0_14 = arith.constant 0 : index
    %c0_15 = arith.constant 0 : index
    %16 = vector.load %arg7[%c0_14, %c0_15] : memref<1x128xf32, #tpu.memory_space<vmem>>, vector<1x128xf32>
    %cst_16 = arith.constant dense<0.000000e+00> : vector<16x128xf32>
    %17 = tpu.matmul %14, %15, %cst_16 {dimension_numbers = #tpu.dot_dimension_numbers<[1], [0], [0], [1], [0, 0, 1, 1], [], []>} : vector<16x256xf32>, vector<256x128xf32>, vector<16x128xf32> -> vector<16x128xf32>
    %18 = vector.broadcast %16 : vector<1x128xf32> to vector<16x128xf32>
    %19 = arith.addf %17, %18 : vector<16x128xf32>
    %c0_17 = arith.constant 0 : index
    %c0_18 = arith.constant 0 : index
    %20 = vector.load %arg8[%c0_17, %c0_18] : memref<16x128xf32, #tpu.memory_space<vmem>>, vector<16x128xf32>
    tpu.vector_store %arg8[%c0_17, %c0_18], %19 {strides = array<i32>} : memref<16x128xf32, #tpu.memory_space<vmem>>, vector<16x128xf32>,
    return
  }
  func.func @transform_0(%arg0: i32) -> (i32, i32) {
    %c0_i32 = arith.constant 0 : i32
    %c0_i32_0 = arith.constant 0 : i32
    return %arg0, %c0_i32 : i32, i32
  }
  func.func @transform_1(%arg0: i32) -> (i32, i32) {
    %c0_i32 = arith.constant 0 : i32
    %c0_i32_0 = arith.constant 0 : i32
    %c0_i32_1 = arith.constant 0 : i32
    return %c0_i32, %c0_i32_0 : i32, i32
  }
  func.func @transform_2(%arg0: i32) -> (i32, i32) {
    %c0_i32 = arith.constant 0 : i32
    %c0_i32_0 = arith.constant 0 : i32
    %c0_i32_1 = arith.constant 0 : i32
    return %c0_i32, %c0_i32_0 : i32, i32
  }
  func.func @transform_3(%arg0: i32) -> (i32, i32) {
    %c0_i32 = arith.constant 0 : i32
    %c0_i32_0 = arith.constant 0 : i32
    %c0_i32_1 = arith.constant 0 : i32
    return %c0_i32, %c0_i32_0 : i32, i32
  }
  func.func @transform_4(%arg0: i32) -> (i32, i32) {
    %c0_i32 = arith.constant 0 : i32
    %c0_i32_0 = arith.constant 0 : i32
    %c0_i32_1 = arith.constant 0 : i32
    return %c0_i32, %c0_i32_0 : i32, i32
  }
  func.func @transform_5(%arg0: i32) -> (i32, i32) {
    %c0_i32 = arith.constant 0 : i32
    %c0_i32_0 = arith.constant 0 : i32
    %c0_i32_1 = arith.constant 0 : i32
    return %c0_i32, %c0_i32_0 : i32, i32
  }
  func.func @transform_6(%arg0: i32) -> (i32, i32) {
    %c0_i32 = arith.constant 0 : i32
    %c0_i32_0 = arith.constant 0 : i32
    %c0_i32_1 = arith.constant 0 : i32
    return %c0_i32, %c0_i32_0 : i32, i32
  }
  func.func @transform_7(%arg0: i32) -> (i32, i32) {
    %c0_i32 = arith.constant 0 : i32
    %c0_i32_0 = arith.constant 0 : i32
    return %arg0, %c0_i32 : i32, i32
  }
}

</mosaic_0001>

<bundles_post_ra>
// kernel: tpu_custom_call.1
= control target key start
LH: loop header
LB: loop body
LE: loop exit
PB: predicated region body
PF: predicated region fallthrough
CT: control target
= control target key end

     0   :  { %12 = vsyncpa [#allocation3], 0  ;;  %s939_s0 = inlined_call_operand.hbm [shape: f32[16,128], index: 0, kind: input, shape index: {}]   ;;  %s940_s1 = inlined_call_operand.hbm [shape: f32[128,256], index: 1, kind: input, shape index: {}]   ;;  %s941_s2 = inlined_call_operand.vmem [shape: f32[1,256], index: 2, kind: input, shape index: {}]   ;;  %s942_s3 = inlined_call_operand.hbm [shape: f32[256,256], index: 3, kind: input, shape index: {}]   ;;  %s943_s4 = inlined_call_operand.vmem [shape: f32[1,256], index: 4, kind: input, shape index: {}]   ;;  %s944_s5 = inlined_call_operand.hbm [shape: f32[256,128], index: 5, kind: input, shape index: {}]   ;;  %s945_s6 = inlined_call_operand.vmem [shape: f32[1,128], index: 6, kind: input, shape index: {}]   ;;  %s946_s7 = inlined_call_operand.hbm [shape: f32[16,128], index: 7, kind: output, shape index: {}]  }
   0x1   :  { %13 = vsyncpa [#allocation6], 0 }
   0x2   :  { %14 = vsyncpa [#allocation9], 0 }
   0x3   :  { %15 = vsyncpa [#allocation4], 0  ;;  %s796_s24 = smov [#allocation5]   ;;  %s678_s28 = scalar_lea.hbm %s940_s1, 4096 }
   0x4   :  { %s33_s25 = sshll.u32 %s796_s24, 4  ;;  %p679_p0 = scmp.ne.s32.totalorder %s940_s1, %s678_s28  ;;  %s34_s25 = int_to_ptr.vmem [resolvable:$true] %s33_s25 }
   0x5   :  { %p682_p1 = scmp.lt.u32.totalorder %s678_s28, %s940_s1 }
   0x7   :  { %p684_p2 = pnand %p682_p1, %p679_p0 }
   0x9   :  { %687 = shalt.err (!%p684_p2)
}
   0xa   :  { %s688_s10 = scalar_lea.vmem %s34_s25, 4096  ;;  %p693_p4 = scmp.lt.s32.totalorder %s34_s25, %s34_s25 }
   0xb   :  { %p689_p3 = scmp.ne.s32.totalorder %s34_s25, %s688_s10  ;;  %p694_p5 = scmp.lt.s32.totalorder %s688_s10, %s688_s10 }
   0xd   :  { %p695_p6 = por %p694_p5, %p693_p4 }
   0xf   :  { %p696_p7 = pnand %p695_p6, %p689_p3 }
  0x11   :  { %699 = shalt.err (!%p696_p7)
}
  0x12   :  { %s797_s11 = smov 256   ;;  %s798_s12 = smov 16  }
  0x13   :  { %39 = dma.hbm_to_vmem [thread:$0]  %s940_s1, 4096, %s34_s25, [#allocation6], %s797_s11, %s797_s11, %s798_s12  }
  0x14   :  { %s799_s15 = smov [#allocation2]   ;;  %s700_s19 = scalar_lea.hbm %s939_s0, 256 }
  0x15   :  { %s21_s16 = sshll.u32 %s799_s15, 4  ;;  %p701_p8 = scmp.ne.s32.totalorder %s939_s0, %s700_s19  ;;  %s22_s16 = int_to_ptr.vmem [resolvable:$true] %s21_s16 }
  0x16   :  { %p704_p9 = scmp.lt.u32.totalorder %s700_s19, %s939_s0 }
  0x18   :  { %p706_p10 = pnand %p704_p9, %p701_p8 }
  0x1a   :  { %709 = shalt.err (!%p706_p10)
}
  0x1b   :  { %s710_s24 = scalar_lea.vmem %s22_s16, 256  ;;  %p715_p12 = scmp.lt.s32.totalorder %s22_s16, %s22_s16 }
  0x1c   :  { %p711_p11 = scmp.ne.s32.totalorder %s22_s16, %s710_s24  ;;  %p716_p13 = scmp.lt.s32.totalorder %s710_s24, %s710_s24 }
  0x1e   :  { %p717_p0 = por %p716_p13, %p715_p12 }
  0x20   :  { %p718_p1 = pnand %p717_p0, %p711_p11 }
  0x22   :  { %721 = shalt.err (!%p718_p1)
}
  0x23   :  { %s800_s1 = smov 128   ;;  %s801_s25 = smov 8  }
  0x24   :  { %27 = dma.hbm_to_vmem [thread:$0]  %s939_s0, 256, %s22_s16, [#allocation3], %s800_s1, %s800_s1, %s801_s25  }
  0x25   :  { %s802_s28 = smov [#allocation7]   ;;  %s803_s30 = smov [#allocation8]  }
  0x26   :  { %s47_s29 = sshll.u32 %s802_s28, 4  ;;  %s61_s8 = sshll.u32 %s803_s30, 4  ;;  %s48_s29 = int_to_ptr.vmem [resolvable:$true] %s47_s29  ;;  %s876_s8 = int_to_ptr.vmem [resolvable:$true] %s61_s8 }
  0x27   :  { %s722_s13 = scalar_lea.hbm %s942_s3, 8192 }
  0x28   :  { %p723_p2 = scmp.ne.s32.totalorder %s942_s3, %s722_s13  ;;  %p726_p3 = scmp.lt.u32.totalorder %s722_s13, %s942_s3 }
  0x2a   :  { %p728_p4 = pnand %p726_p3, %p723_p2 }
  0x2c   :  { %731 = shalt.err (!%p728_p4)
}
  0x2d   :  { %s732_s0 = scalar_lea.vmem %s48_s29, 8192  ;;  %p737_p6 = scmp.lt.s32.totalorder %s48_s29, %s48_s29 }
  0x2e   :  { %p733_p5 = scmp.ne.s32.totalorder %s48_s29, %s732_s0  ;;  %p738_p7 = scmp.lt.s32.totalorder %s732_s0, %s732_s0 }
  0x30   :  { %p739_p8 = por %p738_p7, %p737_p6 }
  0x32   :  { %p740_p9 = pnand %p739_p8, %p733_p5 }
  0x34   :  { %743 = shalt.err (!%p740_p9)
}
  0x35   :  { %53 = dma.hbm_to_vmem [thread:$0]  %s942_s3, 8192, %s48_s29, [#allocation6], %s797_s11, %s797_s11, %s798_s12  }
  0x36   :  { %s744_s22 = scalar_lea.hbm %s944_s5, 4096 }
  0x37   :  { %p745_p10 = scmp.ne.s32.totalorder %s944_s5, %s744_s22  ;;  %p748_p11 = scmp.lt.u32.totalorder %s744_s22, %s944_s5 }
  0x39   :  { %p750_p12 = pnand %p748_p11, %p745_p10 }
  0x3b   :  { %753 = shalt.err (!%p750_p12)
}
  0x3c   :  { %s754_s28 = scalar_lea.vmem %s876_s8, 4096  ;;  %p759_p0 = scmp.lt.s32.totalorder %s876_s8, %s876_s8 }
  0x3d   :  { %p755_p13 = scmp.ne.s32.totalorder %s876_s8, %s754_s28  ;;  %p760_p1 = scmp.lt.s32.totalorder %s754_s28, %s754_s28 }
  0x3f   :  { %p761_p2 = por %p760_p1, %p759_p0 }
  0x41   :  { %p762_p3 = pnand %p761_p2, %p755_p13 }
  0x43   :  { %765 = shalt.err (!%p762_p3)
}
  0x44   :  { %67 = dma.hbm_to_vmem [thread:$0]  %s944_s5, 4096, %s876_s8, [#allocation9], %s800_s1, %s800_s1, %s801_s25  }
  0x45   :  { %788 = dma.done.wait [#allocation3], 256  }
  0x46   :  { %789 = vsyncadd [#allocation3], 4294967040 }
  0x47   :  { %790 = dma.done.wait [#allocation6], 12288  }
  0x48   :  { %791 = vsyncadd [#allocation6], 4294955008 }
  0x49   :  { %792 = dma.done.wait [#allocation9], 4096  }
  0x4a   :  { %793 = vsyncadd [#allocation9], 4294963200  ;;  %v804_v0 = vmov 0.0   ;;  %v85_v1 = vld [vmem:[#allocation5 + $0x8] sm:$0xff]  ;;  %v87_v2 = vld [vmem:[#allocation5 + $0x18] sm:$0xff]  ;;  %s805_s8 = smov [#allocation10]  }
  0x4b   :  { %192 = vmatprep.mubr.f32.mxu0 %v804_v0  ;;  %v84_v3 = vld [vmem:[#allocation5] sm:$0xff]  ;;  %v540_v4 = vpack.c.bf16 %v87_v2, %v85_v1  ;;  %v86_v5 = vld [vmem:[#allocation5 + $0x10] sm:$0xff]  ;;  %v89_v6 = vld [vmem:[#allocation5 + $0x28] sm:$0xff]  ;;  %s487_s9 = sshll.u32 %s805_s8, 4  ;;  %s488_s9 = int_to_ptr.vmem [resolvable:$true] %s487_s9 }
  0x4c   :  { %v91_v7 = vld [vmem:[#allocation5 + $0x38] sm:$0xff]  ;;  %v542_v8 = vpack.c.bf16 %v86_v5, %v84_v3  ;;  %v88_v10 = vld [vmem:[#allocation5 + $0x20] sm:$0xff]  ;;  %v90_v11 = vld [vmem:[#allocation5 + $0x30] sm:$0xff]  ;;  %s766_s10 = scalar_lea.vmem %s488_s9, 256  ;;  %p771_p5 = scmp.lt.s32.totalorder %s488_s9, %s488_s9 }
  0x4d   :  { %v544_v9 = vpack.c.bf16 %v91_v7, %v89_v6  ;;  %v93_v12 = vld [vmem:[#allocation5 + $0x48] sm:$0xff]  ;;  %541 = vmatprep.subr.bf16.mxu0 %v540_v4  ;;  %v95_v13 = vld [vmem:[#allocation5 + $0x58] sm:$0xff]  ;;  %v546_v14 = vpack.c.bf16 %v90_v11, %v88_v10  ;;  %v92_v16 = vld [vmem:[#allocation5 + $0x40] sm:$0xff]  ;;  %p767_p4 = scmp.ne.s32.totalorder %s488_s9, %s766_s10  ;;  %p772_p6 = scmp.lt.s32.totalorder %s766_s10, %s766_s10 }
  0x4e   :  { %543 = vmatpush1.bf16.msra.mxu0 %v542_v8  ;;  %v548_v15 = vpack.c.bf16 %v95_v13, %v93_v12  ;;  %v94_v17 = vld [vmem:[#allocation5 + $0x50] sm:$0xff]  ;;  %v97_v18 = vld [vmem:[#allocation5 + $0x68] sm:$0xff]  ;;  %v99_v19 = vld [vmem:[#allocation5 + $0x78] sm:$0xff] }
  0x4f   :  { %545 = vmatprep.subr.bf16.mxu0 %v544_v9  ;;  %v550_v20 = vpack.c.bf16 %v94_v17, %v92_v16  ;;  %v552_v21 = vpack.c.bf16 %v99_v19, %v97_v18  ;;  %v96_v22 = vld [vmem:[#allocation5 + $0x60] sm:$0xff]  ;;  %v98_v23 = vld [vmem:[#allocation5 + $0x70] sm:$0xff]  ;;  %v101_v24 = vld [vmem:[#allocation5 + $0x88] sm:$0xff]  ;;  %p773_p7 = por %p772_p6, %p771_p5 }
  0x50   :  { %v103_v25 = vld [vmem:[#allocation5 + $0x98] sm:$0xff]  ;;  %v100_v26 = vld [vmem:[#allocation5 + $0x80] sm:$0xff]  ;;  %v102_v27 = vld [vmem:[#allocation5 + $0x90] sm:$0xff]  ;;  %v554_v30 = vpack.c.bf16 %v98_v23, %v96_v22 }
  0x51   :  { %v210_v28 = vld [vmem:[#allocation7 + $0x8] sm:$0xff]  ;;  %v212_v29 = vld [vmem:[#allocation7 + $0x18] sm:$0xff]  ;;  %v209_v33 = vld [vmem:[#allocation7] sm:$0xff]  ;;  %v556_v36 = vpack.c.bf16 %v103_v25, %v101_v24  ;;  %v558_v46 = vpack.c.bf16 %v102_v27, %v100_v26  ;;  %p774_p8 = pnand %p773_p7, %p767_p4 }
  0x52   :  { %547 = vmatpush1.bf16.msra.mxu0 %v546_v14  ;;  %v105_v31 = vld [vmem:[#allocation5 + $0xa8] sm:$0xff]  ;;  %v572_v32 = vpack.c.bf16 %v212_v29, %v210_v28  ;;  %v211_v34 = vld [vmem:[#allocation7 + $0x10] sm:$0xff]  ;;  %v216_v38 = vld [vmem:[#allocation7 + $0x38] sm:$0xff] }
  0x53   :  { %549 = vmatprep.subr.bf16.mxu0 %v548_v15  ;;  %v214_v35 = vld [vmem:[#allocation7 + $0x28] sm:$0xff]  ;;  %v574_v37 = vpack.c.bf16 %v211_v34, %v209_v33  ;;  %v213_v39 = vld [vmem:[#allocation7 + $0x20] sm:$0xff]  ;;  %v215_v40 = vld [vmem:[#allocation7 + $0x30] sm:$0xff] }
  0x54   :  { %v107_v41 = vld [vmem:[#allocation5 + $0xb8] sm:$0xff]  ;;  %573 = vmatprep.subr.bf16.mxu1 %v572_v32  ;;  %v576_v42 = vpack.c.bf16 %v216_v38, %v214_v35  ;;  %v218_v43 = vld [vmem:[#allocation7 + $0x48] sm:$0xff]  ;;  %v578_v45 = vpack.c.bf16 %v215_v40, %v213_v39  ;;  %v104_v47 = vld [vmem:[#allocation5 + $0xa0] sm:$0xff] }
  0x55   :  { %v220_v44 = vld [vmem:[#allocation7 + $0x58] sm:$0xff]  ;;  %575 = vmatpush1.bf16.msra.mxu1 %v574_v37  ;;  %v217_v49 = vld [vmem:[#allocation7 + $0x40] sm:$0xff]  ;;  %v219_v50 = vld [vmem:[#allocation7 + $0x50] sm:$0xff]  ;;  %v560_v51 = vpack.c.bf16 %v107_v41, %v105_v31 }
  0x56   :  { %551 = vmatpush1.bf16.msra.mxu0 %v550_v20  ;;  %577 = vmatprep.subr.bf16.mxu1 %v576_v42  ;;  %v580_v48 = vpack.c.bf16 %v220_v44, %v218_v43  ;;  %v106_v52 = vld [vmem:[#allocation5 + $0xb0] sm:$0xff]  ;;  %v222_v53 = vld [vmem:[#allocation7 + $0x68] sm:$0xff]  ;;  %v224_v54 = vld [vmem:[#allocation7 + $0x78] sm:$0xff]  ;;  %v582_v57 = vpack.c.bf16 %v219_v50, %v217_v49 }
  0x57   :  { %553 = vmatprep.subr.bf16.mxu0 %v552_v21  ;;  %v109_v55 = vld [vmem:[#allocation5 + $0xc8] sm:$0xff]  ;;  %v111_v56 = vld [vmem:[#allocation5 + $0xd8] sm:$0xff]  ;;  %v562_v58 = vpack.c.bf16 %v106_v52, %v104_v47  ;;  %v108_v59 = vld [vmem:[#allocation5 + $0xc0] sm:$0xff]  ;;  %v584_v60 = vpack.c.bf16 %v224_v54, %v222_v53 }
  0x58   :  { %v221_v61 = vld [vmem:[#allocation7 + $0x60] sm:$0xff]  ;;  %v223_v62 = vld [vmem:[#allocation7 + $0x70] sm:$0xff]  ;;  %v564_v63 = vpack.c.bf16 %v111_v56, %v109_v55  ;;  %v226_v2 = vld [vmem:[#allocation7 + $0x88] sm:$0xff] }
  0x59   :  { %579 = vmatpush1.bf16.msra.mxu1 %v578_v45  ;;  %v110_v1 = vld [vmem:[#allocation5 + $0xd0] sm:$0xff]  ;;  %v228_v3 = vld [vmem:[#allocation7 + $0x98] sm:$0xff]  ;;  %v113_v4 = vld [vmem:[#allocation5 + $0xe8] sm:$0xff]  ;;  %v586_v6 = vpack.c.bf16 %v223_v62, %v221_v61 }
  0x5a   :  { %555 = vmatpush1.bf16.msra.mxu0 %v554_v30  ;;  %581 = vmatprep.subr.bf16.mxu1 %v580_v48  ;;  %v115_v5 = vld [vmem:[#allocation5 + $0xf8] sm:$0xff]  ;;  %v566_v7 = vpack.c.bf16 %v110_v1, %v108_v59  ;;  %v112_v8 = vld [vmem:[#allocation5 + $0xe0] sm:$0xff]  ;;  %v588_v9 = vpack.c.bf16 %v228_v3, %v226_v2  ;;  %v227_v11 = vld [vmem:[#allocation7 + $0x90] sm:$0xff] }
  0x5b   :  { %557 = vmatprep.subr.bf16.mxu0 %v556_v36  ;;  %v225_v10 = vld [vmem:[#allocation7 + $0x80] sm:$0xff]  ;;  %v568_v12 = vpack.c.bf16 %v115_v5, %v113_v4  ;;  %v114_v13 = vld [vmem:[#allocation5 + $0xf0] sm:$0xff]  ;;  %v230_v14 = vld [vmem:[#allocation7 + $0xa8] sm:$0xff] }
  0x5c   :  { %v232_v15 = vld [vmem:[#allocation7 + $0xb8] sm:$0xff]  ;;  %v590_v16 = vpack.c.bf16 %v227_v11, %v225_v10  ;;  %v570_v17 = vpack.c.bf16 %v114_v13, %v112_v8  ;;  %v229_v19 = vld [vmem:[#allocation7 + $0xa0] sm:$0xff]  ;;  %v231_v20 = vld [vmem:[#allocation7 + $0xb0] sm:$0xff] }
  0x5d   :  { %583 = vmatpush1.bf16.msra.mxu1 %v582_v57  ;;  %v592_v18 = vpack.c.bf16 %v232_v15, %v230_v14  ;;  %v234_v21 = vld [vmem:[#allocation7 + $0xc8] sm:$0xff]  ;;  %v236_v22 = vld [vmem:[#allocation7 + $0xd8] sm:$0xff]  ;;  %v594_v23 = vpack.c.bf16 %v231_v20, %v229_v19  ;;  %v82_v24 = vld [vmem:[#allocation2] sm:$0xff] }
  0x5e   :  { %559 = vmatpush1.bf16.msra.mxu0 %v558_v46  ;;  %585 = vmatprep.subr.bf16.mxu1 %v584_v60  ;;  %v596_v25 = vpack.c.bf16 %v236_v22, %v234_v21  ;;  %v233_v26 = vld [vmem:[#allocation7 + $0xc0] sm:$0xff]  ;;  %v235_v27 = vld [vmem:[#allocation7 + $0xd0] sm:$0xff]  ;;  %v238_v28 = vld [vmem:[#allocation7 + $0xe8] sm:$0xff] }
  0x5f   :  { %561 = vmatprep.subr.bf16.mxu0 %v560_v51  ;;  %v240_v29 = vld [vmem:[#allocation7 + $0xf8] sm:$0xff]  ;;  %v598_v30 = vpack.c.bf16 %v235_v27, %v233_v26  ;;  %v237_v33 = vld [vmem:[#allocation7 + $0xe0] sm:$0xff]  ;;  %v239_v34 = vld [vmem:[#allocation7 + $0xf0] sm:$0xff] }
  0x60   :  { %v83_v31 = vld [vmem:[#allocation2 + $0x8] sm:$0xff]  ;;  %v600_v32 = vpack.c.bf16 %v240_v29, %v238_v28  ;;  %v242_v35 = vld [vmem:[#allocation7 + $0x108] sm:$0xff]  ;;  %v602_v37 = vpack.c.bf16 %v239_v34, %v237_v33  ;;  %v241_v39 = vld [vmem:[#allocation7 + $0x100] sm:$0xff] }
  0x61   :  { %587 = vmatpush1.bf16.msra.mxu1 %v586_v6  ;;  %v244_v36 = vld [vmem:[#allocation7 + $0x118] sm:$0xff]  ;;  %v243_v40 = vld [vmem:[#allocation7 + $0x110] sm:$0xff]  ;;  %v246_v41 = vld [vmem:[#allocation7 + $0x128] sm:$0xff] }
  0x62   :  { %563 = vmatpush1.bf16.msra.mxu0 %v562_v58  ;;  %589 = vmatprep.subr.bf16.mxu1 %v588_v9  ;;  %v604_v38 = vpack.c.bf16 %v244_v36, %v242_v35  ;;  %v248_v42 = vld [vmem:[#allocation7 + $0x138] sm:$0xff]  ;;  %v606_v43 = vpack.c.bf16 %v243_v40, %v241_v39  ;;  %v245_v44 = vld [vmem:[#allocation7 + $0x120] sm:$0xff]  ;;  %v247_v45 = vld [vmem:[#allocation7 + $0x130] sm:$0xff] }
  0x63   :  { %565 = vmatprep.subr.bf16.mxu0 %v564_v63  ;;  %v250_v46 = vld [vmem:[#allocation7 + $0x148] sm:$0xff]  ;;  %v252_v47 = vld [vmem:[#allocation7 + $0x158] sm:$0xff]  ;;  %v610_v48 = vpack.c.bf16 %v247_v45, %v245_v44  ;;  %v249_v50 = vld [vmem:[#allocation7 + $0x140] sm:$0xff] }
  0x64   :  { %v612_v49 = vpack.c.bf16 %v252_v47, %v250_v46  ;;  %v251_v51 = vld [vmem:[#allocation7 + $0x150] sm:$0xff]  ;;  %v254_v52 = vld [vmem:[#allocation7 + $0x168] sm:$0xff]  ;;  %v256_v53 = vld [vmem:[#allocation7 + $0x178] sm:$0xff] }
  0x65   :  { %591 = vmatpush1.bf16.msra.mxu1 %v590_v16  ;;  %v614_v54 = vpack.c.bf16 %v251_v51, %v249_v50  ;;  %v616_v55 = vpack.c.bf16 %v256_v53, %v254_v52  ;;  %v253_v56 = vld [vmem:[#allocation7 + $0x160] sm:$0xff]  ;;  %v255_v57 = vld [vmem:[#allocation7 + $0x170] sm:$0xff]  ;;  %v258_v58 = vld [vmem:[#allocation7 + $0x188] sm:$0xff] }
  0x66   :  { %567 = vmatpush1.bf16.msra.mxu0 %v566_v7  ;;  %593 = vmatprep.subr.bf16.mxu1 %v592_v18  ;;  %v260_v59 = vld [vmem:[#allocation7 + $0x198] sm:$0xff]  ;;  %v618_v60 = vpack.c.bf16 %v255_v57, %v253_v56  ;;  %v257_v62 = vld [vmem:[#allocation7 + $0x180] sm:$0xff]  ;;  %v259_v63 = vld [vmem:[#allocation7 + $0x190] sm:$0xff] }
  0x67   :  { %569 = vmatprep.subr.bf16.mxu0 %v568_v12  ;;  %v620_v61 = vpack.c.bf16 %v260_v59, %v258_v58  ;;  %v262_v1 = vld [vmem:[#allocation7 + $0x1a8] sm:$0xff]  ;;  %v264_v2 = vld [vmem:[#allocation7 + $0x1b8] sm:$0xff]  ;;  %v622_v3 = vpack.c.bf16 %v259_v63, %v257_v62  ;;  %v261_v5 = vld [vmem:[#allocation7 + $0x1a0] sm:$0xff]  ;;  %v118_v58 = vlaneseq }
  0x68   :  { %v624_v4 = vpack.c.bf16 %v264_v2, %v262_v1  ;;  %v263_v6 = vld [vmem:[#allocation7 + $0x1b0] sm:$0xff]  ;;  %v266_v7 = vld [vmem:[#allocation7 + $0x1c8] sm:$0xff]  ;;  %v268_v8 = vld [vmem:[#allocation7 + $0x1d8] sm:$0xff] }
  0x69   :  { %595 = vmatpush1.bf16.msra.mxu1 %v594_v23  ;;  %v626_v9 = vpack.c.bf16 %v263_v6, %v261_v5  ;;  %v628_v10 = vpack.c.bf16 %v268_v8, %v266_v7  ;;  %v265_v11 = vld [vmem:[#allocation7 + $0x1c0] sm:$0xff]  ;;  %v267_v12 = vld [vmem:[#allocation7 + $0x1d0] sm:$0xff]  ;;  %v270_v14 = vld [vmem:[#allocation7 + $0x1e8] sm:$0xff]  ;;  %v119_v59 = vshrl.u32 %v118_v58, 7 }
  0x6a   :  { %571 = vmatpush1.bf16.msra.mxu0 %v570_v17  ;;  %597 = vmatprep.subr.bf16.mxu1 %v596_v25  ;;  %v630_v13 = vpack.c.bf16 %v267_v12, %v265_v11  ;;  %v272_v15 = vld [vmem:[#allocation7 + $0x1f8] sm:$0xff]  ;;  %v269_v17 = vld [vmem:[#allocation7 + $0x1e0] sm:$0xff]  ;;  %v271_v18 = vld [vmem:[#allocation7 + $0x1f0] sm:$0xff] }
  0x6b   :  { %v632_v16 = vpack.c.bf16 %v272_v15, %v270_v14  ;;  %v634_v19 = vpack.c.bf16 %v271_v18, %v269_v17  ;;  %v382_v20 = vld [vmem:[#allocation8 + $0x80] sm:$0xff]  ;;  %v383_v21 = vld [vmem:[#allocation8 + $0x88] sm:$0xff]  ;;  %v384_v25 = vld [vmem:[#allocation8 + $0x90] sm:$0xff]  ;;  %v124_v62 = vsub.s32 1, %v119_v59 }
  0x6c   :  { %v366_v22 = vld [vmem:[#allocation8] sm:$0xff]  ;;  %v636_v23 = vpack.c.bf16 %v383_v21, %v382_v20  ;;  %v385_v26 = vld [vmem:[#allocation8 + $0x98] sm:$0xff]  ;;  %v368_v29 = vld [vmem:[#allocation8 + $0x10] sm:$0xff] }
  0x6d   :  { %193 = vmatmul.mubr.f32.vlgmr.msra.gmra.mrb[0].mxu0 %v82_v24  ;;  %599 = vmatpush1.bf16.msra.mxu1 %v598_v30  ;;  %v367_v24 = vld [vmem:[#allocation8 + $0x8] sm:$0xff]  ;;  %v640_v28 = vpack.c.bf16 %v385_v26, %v384_v25  ;;  %v369_v30 = vld [vmem:[#allocation8 + $0x18] sm:$0xff]  ;;  %v370_v35 = vld [vmem:[#allocation8 + $0x20] sm:$0xff] }
  0x6e   :  { %198 = vmatprep.mubr.f32.mxu0 %v804_v0  ;;  %601 = vmatprep.subr.bf16.mxu1 %v600_v32  ;;  %v608_v0 = vpack.c.bf16 %v248_v42, %v246_v41  ;;  %v638_v27 = vpack.c.bf16 %v367_v24, %v366_v22  ;;  %v387_v32 = vld [vmem:[#allocation8 + $0xa8] sm:$0xff]  ;;  %v642_v33 = vpack.c.bf16 %v369_v30, %v368_v29  ;;  %v372_v41 = vld [vmem:[#allocation8 + $0x30] sm:$0xff]  ;;  %v373_v42 = vld [vmem:[#allocation8 + $0x38] sm:$0xff] }
  0x6f   :  { %637 = vmatprep.subr.bf16.mxu0 %v636_v23  ;;  %v371_v36 = vld [vmem:[#allocation8 + $0x28] sm:$0xff]  ;;  %v650_v44 = vpack.c.bf16 %v373_v42, %v372_v41  ;;  %v374_v46 = vld [vmem:[#allocation8 + $0x40] sm:$0xff]  ;;  %v376_v52 = vld [vmem:[#allocation8 + $0x50] sm:$0xff] }
  0x70   :  { %639 = vmatpush3.bf16.msra.mxu0 %v638_v27  ;;  %v646_v39 = vpack.c.bf16 %v371_v36, %v370_v35  ;;  %v375_v47 = vld [vmem:[#allocation8 + $0x48] sm:$0xff]  ;;  %v377_v53 = vld [vmem:[#allocation8 + $0x58] sm:$0xff]  ;;  %v378_v14 = vld [vmem:[#allocation8 + $0x60] sm:$0xff] }
  0x71   :  { %199 = vmatmul.mubr.f32.gmra.mrb[2].mxu0 %v83_v31  ;;  %603 = vmatpush1.bf16.msra.mxu1 %v602_v37  ;;  %v386_v31 = vld [vmem:[#allocation8 + $0xa0] sm:$0xff]  ;;  %v388_v37 = vld [vmem:[#allocation8 + $0xb0] sm:$0xff]  ;;  %v654_v50 = vpack.c.bf16 %v375_v47, %v374_v46  ;;  %v658_v56 = vpack.c.bf16 %v377_v53, %v376_v52  ;;  %v379_v15 = vld [vmem:[#allocation8 + $0x68] sm:$0xff] }
  0x72   :  { %605 = vmatprep.subr.bf16.mxu1 %v604_v38  ;;  %641 = vmatprep.subr.bf16.mxu0 %v640_v28  ;;  %v644_v34 = vpack.c.bf16 %v387_v32, %v386_v31  ;;  %v389_v38 = vld [vmem:[#allocation8 + $0xb8] sm:$0xff]  ;;  %v396_v17 = vld [vmem:[#allocation8 + $0xf0] sm:$0xff] }
  0x73   :  { %v648_v40 = vpack.c.bf16 %v389_v38, %v388_v37  ;;  %v397_v18 = vld [vmem:[#allocation8 + $0xf8] sm:$0xff]  ;;  %v380_v20 = vld [vmem:[#allocation8 + $0x70] sm:$0xff] }
  0x74   :  { %643 = vmatpush3.bf16.msra.mxu0 %v642_v33  ;;  %v381_v21 = vld [vmem:[#allocation8 + $0x78] sm:$0xff]  ;;  %v273_v23 = vld [vmem:[%s943_s4] sm:$0x3] }
  0x75   :  { %607 = vmatpush1.bf16.msra.mxu1 %v606_v43  ;;  %645 = vmatprep.subr.bf16.mxu0 %v644_v34  ;;  %v390_v43 = vld [vmem:[#allocation8 + $0xc0] sm:$0xff]  ;;  %v666_v22 = vpack.c.bf16 %v381_v21, %v380_v20  ;;  %v282_v25 = vrot.slane %v273_v23, %v124_v62 }
  0x76   :  { %609 = vmatprep.subr.bf16.mxu1 %v608_v0  ;;  %v391_v0 = vld [vmem:[#allocation8 + $0xc8] sm:$0xff] }
  0x77   :  { %v652_v45 = vpack.c.bf16 %v391_v0, %v390_v43 }
  0x78   :  { %647 = vmatpush3.bf16.msra.mxu0 %v646_v39  ;;  %v501_v39 = vld [vmem:[%s945_s6] ss:$0 sm:$0xff] }
  0x79   :  { %611 = vmatpush1.bf16.msra.mxu1 %v610_v48  ;;  %649 = vmatprep.subr.bf16.mxu0 %v648_v40  ;;  %v392_v48 = vld [vmem:[#allocation8 + $0xd0] sm:$0xff] }
  0x7a   :  { %613 = vmatprep.subr.bf16.mxu1 %v612_v49  ;;  %v393_v49 = vld [vmem:[#allocation8 + $0xd8] sm:$0xff] }
  0x7b   :  { %v656_v51 = vpack.c.bf16 %v393_v49, %v392_v48 }
  0x7c   :  { %651 = vmatpush3.bf16.msra.mxu0 %v650_v44 }
  0x7d   :  { %615 = vmatpush1.bf16.msra.mxu1 %v614_v54  ;;  %653 = vmatprep.subr.bf16.mxu0 %v652_v45  ;;  %v394_v54 = vld [vmem:[#allocation8 + $0xe0] sm:$0xff] }
  0x7e   :  { %617 = vmatprep.subr.bf16.mxu1 %v616_v55  ;;  %v395_v55 = vld [vmem:[#allocation8 + $0xe8] sm:$0xff] }
  0x7f   :  { %v660_v57 = vpack.c.bf16 %v395_v55, %v394_v54 }
  0x80   :  { %655 = vmatpush3.bf16.msra.mxu0 %v654_v50 }
  0x81   :  { %619 = vmatpush1.bf16.msra.mxu1 %v618_v60  ;;  %657 = vmatprep.subr.bf16.mxu0 %v656_v51  ;;  %v120_v60 = vsub.s32 0, %v119_v59 }
  0x82   :  { %621 = vmatprep.subr.bf16.mxu1 %v620_v61  ;;  %v116_v61 = vld [vmem:[%s941_s2] sm:$0x3] }
  0x83   :  { %v121_v63 = vrot.slane %v116_v61, %v120_v60  ;;  %v125_v1 = vrot.slane %v116_v61, %v124_v62  ;;  %v278_v24 = vrot.slane %v273_v23, %v120_v60 }
  0x84   :  { %659 = vmatpush3.bf16.msra.mxu0 %v658_v56 }
  0x85   :  { %623 = vmatpush1.bf16.msra.mxu1 %v622_v3  ;;  %661 = vmatprep.subr.bf16.mxu0 %v660_v57 }
  0x86   :  { %625 = vmatprep.subr.bf16.mxu1 %v624_v4 }
  0x89   :  { %627 = vmatpush1.bf16.msra.mxu1 %v626_v9 }
  0x8a   :  { %629 = vmatprep.subr.bf16.mxu1 %v628_v10 }
  0x8d   :  { %631 = vmatpush1.bf16.msra.mxu1 %v630_v13 }
  0x8e   :  { %633 = vmatprep.subr.bf16.mxu1 %v632_v16  ;;  %v662_v16 = vpack.c.bf16 %v379_v15, %v378_v14 }
  0x90   :  { %663 = vmatpush3.bf16.msra.mxu0 %v662_v16 }
  0x91   :  { %635 = vmatpush1.bf16.msra.mxu1 %v634_v19  ;;  %v664_v19 = vpack.c.bf16 %v397_v18, %v396_v17 }
  0x93   :  { %665 = vmatprep.subr.bf16.mxu0 %v664_v19 }
  0x94   :  { %667 = vmatpush3.bf16.msra.mxu0 %v666_v22 }
 0x140   :  { %v194_v2 = vpop.f32.mrb[0].mxu0 }
 0x141   :  { %v195_v3 = vadd.f32 %v194_v2, %v121_v63  ;;  %v196_v4 = vpop.f32.mrb[1].mxu0 }
 0x142   :  { %v197_v5 = vadd.f32 %v196_v4, %v125_v1 }
 0x143   :  { %v205_v8 = vmax.f32 %v195_v3, 0.0 }
 0x144   :  { %v200_v6 = vpop.f32.mrb[2].mxu0  ;;  %v206_v7 = vmax.f32 %v197_v5, 0.0 }
 0x145   :  { %v201_v9 = vadd.f32 %v200_v6, %v121_v63  ;;  %v202_v10 = vpop.f32.mrb[3].mxu0 }
 0x146   :  { %v203_v11 = vadd.f32 %v202_v10, %v125_v1  ;;  %349 = vmatprep.mubr.f32.mxu1 %v206_v7 }
 0x147   :  { %350 = vmatmul.mubr.f32.vlgmr.msra.gmra.mrb[0].mxu1 %v205_v8  ;;  %v207_v13 = vmax.f32 %v201_v9, 0.0 }
 0x148   :  { %v208_v12 = vmax.f32 %v203_v11, 0.0 }
 0x14a   :  { %355 = vmatprep.mubr.f32.mxu1 %v208_v12 }
 0x14b   :  { %356 = vmatmul.mubr.f32.gmra.mrb[2].mxu1 %v207_v13 }
 0x21a   :  { %v351_v26 = vpop.f32.mrb[0].mxu1 }
 0x21b   :  { %v352_v27 = vadd.f32 %v351_v26, %v278_v24  ;;  %v353_v28 = vpop.f32.mrb[1].mxu1 }
 0x21c   :  { %v354_v29 = vadd.f32 %v353_v28, %v282_v25 }
 0x21d   :  { %v362_v32 = vmax.f32 %v352_v27, 0.0 }
 0x21e   :  { %v363_v30 = vmax.f32 %v354_v29, 0.0  ;;  %v357_v31 = vpop.f32.mrb[2].mxu1 }
 0x21f   :  { %v358_v33 = vadd.f32 %v357_v31, %v278_v24  ;;  %v359_v34 = vpop.f32.mrb[3].mxu1 }
 0x220   :  { %v360_v35 = vadd.f32 %v359_v34, %v282_v25  ;;  %469 = vmatprep.mubr.f32.mxu0 %v363_v30 }
 0x221   :  { %470 = vmatmul.mubr.f32.vlgmr.msra.gmra.mrb[4].mxu0 %v362_v32  ;;  %v364_v37 = vmax.f32 %v358_v33, 0.0 }
 0x222   :  { %v365_v36 = vmax.f32 %v360_v35, 0.0 }
 0x224   :  { %474 = vmatprep.mubr.f32.mxu0 %v365_v36 }
 0x225   :  { %475 = vmatmul.mubr.f32.gmra.mrb[6].mxu0 %v364_v37 }
 0x2f4   :  { %v534_v38 = vpop.f32.mrb[4].mxu0 }
 0x2f5   :  { %v535_v40 = vpop.f32.mrb[5].mxu0 }
 0x2f6   :  { %v536_v41 = vadd.f32 %v535_v40, %v534_v38 }
 0x2f8   :  { %v472_v42 = vadd.f32 %v536_v41, %v501_v39  ;;  %v537_v43 = vpop.f32.mrb[6].mxu0 }
 0x2f9   :  { %v538_v0 = vpop.f32.mrb[7].mxu0 }
 0x2fa   :  { %480 = vst [vmem:[#allocation10] sm:$0xff] %v472_v42  ;;  %v539_v44 = vadd.f32 %v538_v0, %v537_v43 }
 0x2fc   :  { %v477_v45 = vadd.f32 %v539_v44, %v501_v39 }
 0x2fe   :  { %481 = vst [vmem:[#allocation10 + $0x8] sm:$0xff] %v477_v45 }
 0x2ff   :  { %777 = shalt.err (!%p774_p8)
}
 0x300   :  { %s778_s14 = scalar_lea.hbm %s946_s7, 256 }
 0x301   :  { %p779_p9 = scmp.ne.s32.totalorder %s946_s7, %s778_s14  ;;  %p782_p10 = scmp.lt.u32.totalorder %s778_s14, %s946_s7 }
 0x303   :  { %p784_p11 = pnand %p782_p10, %p779_p9 }
 0x305   :  { %787 = shalt.err (!%p784_p11)
}
 0x306   :  { %493 = dma.vmem_to_hbm [thread:$0]  %s488_s9, 256, %s946_s7, [#allocation4], %s800_s1, %s800_s1, %s801_s25  }
 0x307   :  { %794 = dma.done.wait [#allocation4], 256  }
 0x308   :  { %795 = vsyncadd [#allocation4], 4294967040 }
 0x309   :  { %497 = vsyncpa [#allocation3], 1 }
 0x30a   :  { %498 = vsyncpa [#allocation6], 1 }
 0x30b   :  { %499 = vsyncpa [#allocation9], 1 }
 0x30c   :  { %500 = vsyncpa [#allocation4], 1 }

</bundles_post_ra>
